<compile_context>
chip_gen: v7x
topology: tpu7x:2x2x1
jax: 0.10.0
libtpu: 0.0.40
codegen_flags: <defaults>
</compile_context>

<pallas_src>
import functools
import math

import jax
import jax.numpy as jnp
import numpy as np
from jax import lax
from jax.experimental import pallas as pl
from jax.experimental.pallas import tpu as pltpu


def _semantic_attention_kernel(q_ref, k_ref, v_ref, p_ref, *refs,
                               q_size, k_size, has_mask):
    if has_mask:
        m_ref, attn_ref, ew_ref = refs
    else:
        m_ref, (attn_ref, ew_ref) = None, refs

    # --- packed parameters: static ref slices (zero runtime cost) -------------
    Wt = p_ref[pl.ds(0, q_size), :]                  # (Q, N)
    Ut = p_ref[pl.ds(q_size, k_size), :]             # (K, N)
    b = p_ref[pl.ds(q_size + k_size, 1), :]          # (1, N)
    wv = p_ref[pl.ds(q_size + k_size + 1, 1), :]     # (1, N)

    q = q_ref[0]                                     # (1, Q)  this batch's query
    k = k_ref[...]                                   # (S, K)  this batch's keys
    v = v_ref[...]                                   # (S, V)  this batch's values

    # --- projections: bf16 MXU operands, f32 accumulation; bias folded once ---
    bf = jnp.bfloat16
    wh = jnp.dot(q.astype(bf), Wt.astype(bf),
                 preferred_element_type=jnp.float32) + b                  # (1, N)
    uv = jnp.dot(k.astype(bf), Ut.astype(bf),
                 preferred_element_type=jnp.float32)                      # (S, N)

    # --- additive energies: tanh in f32, N-contraction on the MXU (trans_b) ---
    h = jnp.tanh(uv + wh)                                                 # (S, N)
    energies = lax.dot_general(h, wv, (((1,), (1,)), ((), ())),
                               preferred_element_type=jnp.float32)        # (S, 1)
    if has_mask:
        energies = jnp.where(m_ref[...] != 0.0, -jnp.inf, energies)

    # --- softmax over S (sublane axis; no relayout), exact normalization ------
    e_max = jnp.max(energies, axis=0, keepdims=True)                      # (1, 1)
    ex = jnp.exp(energies - e_max)                                        # (S, 1)
    weights = ex / jnp.sum(ex, axis=0, keepdims=True)                     # (S, 1)

    # --- weighted value reduction in the natural (S, V) layout ----------------
    attn = jnp.sum(v * weights, axis=0, keepdims=True)                    # (1, V)

    attn_ref[0] = attn.astype(attn_ref.dtype)
    ew_ref[...] = jnp.concatenate([energies, weights], axis=-1).astype(ew_ref.dtype)


def semantic_attention(query, keys, values, W_t, U_t, b, w_vec, masks=None):
    """Pallas implementation of SemanticAttention.forward."""
    B, Qd = query.shape
    _, S, Kd = keys.shape
    V = values.shape[-1]
    N = W_t.shape[1]

    # Free (metadata-only) reshapes; no transposes, no extra passes over `values`.
    query3 = query.reshape(B, 1, Qd)
    keys2 = keys.reshape(B * S, Kd)
    values2 = values.reshape(B * S, V)
    # Pack all parameters into one (Q+K+2, N) slab -> one input DMA instead of four.
    # (In a real model this packing would happen once at init, not per forward call.)
    params = jnp.concatenate(
        [W_t, U_t, b.reshape(1, N), w_vec.reshape(1, N)], axis=0)

    has_mask = masks is not None
    inputs = [query3, keys2, values2, params]
    in_specs = [
        pl.BlockSpec((1, 1, Qd), lambda bi: (bi, 0, 0)),
        pl.BlockSpec((S, Kd), lambda bi: (bi, 0)),
        pl.BlockSpec((S, V), lambda bi: (bi, 0)),
        pl.BlockSpec((Qd + Kd + 2, N), lambda bi: (0, 0)),
    ]
    if has_mask:
        inputs.append(masks.astype(jnp.float32).reshape(B * S, 1))
        in_specs.append(pl.BlockSpec((S, 1), lambda bi: (bi, 0)))

    kernel = functools.partial(_semantic_attention_kernel,
                               q_size=Qd, k_size=Kd, has_mask=has_mask)

    attn3, ew = pl.pallas_call(
        kernel,
        out_shape=(
            jax.ShapeDtypeStruct((B, 1, V), jnp.float32),     # attn (V on lanes)
            jax.ShapeDtypeStruct((B * S, 2), jnp.float32),    # [energies | weights]
        ),
        grid=(B,),
        in_specs=in_specs,
        out_specs=(
            pl.BlockSpec((1, 1, V), lambda bi: (bi, 0, 0)),
            pl.BlockSpec((S, 2), lambda bi: (bi, 0)),
        ),
        compiler_params=pltpu.CompilerParams(
            dimension_semantics=("parallel",)),               # dual-TC on v7x
    )(*inputs)

    # Match the PyTorch output shapes: (B, V), (B, S, 1), (B, S, 1).
    attn = attn3.reshape(B, V)
    energies = ew[:, 0].reshape(B, S, 1)
    weights = ew[:, 1].reshape(B, S, 1)
    return attn, weights, energies


def semantic_attention_reference(query, keys, values, W_t, U_t, b, w_vec, masks=None):
    """Pure-JAX reference mirroring the PyTorch forward."""
    Wh = query @ W_t                                     # (B, N)
    Uv = jnp.einsum('bsk,kn->bsn', keys, U_t)            # (B, S, N)
    h = jnp.tanh(Wh[:, None, :] + Uv + b[None, None, :])
    energies = jnp.einsum('bsn,n->bs', h, w_vec)         # (B, S)
    if masks is not None:
        energies = jnp.where(masks, -jnp.inf, energies)
    weights = jax.nn.softmax(energies, axis=1)
    attn = jnp.sum(values * weights[:, :, None], axis=1)
    return attn, weights[:, :, None], energies[:, :, None]


if __name__ == "__main__":
    # Small shapes consistent with the module: query (B, Q), keys (B, S, K), values (B, S, V).
    B, Q, K, N, S, V = 2, 24, 16, 32, 32, 48

    key = jax.random.PRNGKey(0)
    kW, kU, kw, kq, kk, kv, km = jax.random.split(key, 7)

    # Deterministic parameter init (nn.Linear stored as (out, in) -> pass transposed).
    W_t = jax.random.normal(kW, (Q, N), jnp.float32) * (1.0 / math.sqrt(Q))
    U_t = jax.random.normal(kU, (K, N), jnp.float32) * (1.0 / math.sqrt(K))
    b = jnp.ones((N,), jnp.float32)                       # nn.Parameter(torch.ones(N))
    w_vec = jax.random.normal(kw, (N,), jnp.float32) * (1.0 / math.sqrt(N))

    query = jax.random.normal(kq, (B, Q), jnp.float32)
    keys = jax.random.normal(kk, (B, S, K), jnp.float32)
    values = jax.random.normal(kv, (B, S, V), jnp.float32)

    # Tolerance absorbs the bf16 MXU operands (activations stay f32).
    RTOL = ATOL = 2e-2

    # --- masks=None path -------------------------------------------------------
    attn, weights, energies = semantic_attention(query, keys, values, W_t, U_t, b, w_vec)
    jax.block_until_ready((attn, weights, energies))
    ref_attn, ref_w, ref_e = semantic_attention_reference(
        query, keys, values, W_t, U_t, b, w_vec)

    assert attn.shape == (B, V) and weights.shape == (B, S, 1) and energies.shape == (B, S, 1)
    np.testing.assert_allclose(np.asarray(energies), np.asarray(ref_e), rtol=RTOL, atol=ATOL)
    np.testing.assert_allclose(np.asarray(weights), np.asarray(ref_w), rtol=RTOL, atol=ATOL)
    np.testing.assert_allclose(np.asarray(attn), np.asarray(ref_attn), rtol=RTOL, atol=ATOL)

    # --- boolean-mask path (mask True -> -inf energy, zero weight) -------------
    masks = jax.random.bernoulli(km, 0.25, (B, S))
    attn_m, w_m, e_m = semantic_attention(query, keys, values, W_t, U_t, b, w_vec, masks=masks)
    jax.block_until_ready((attn_m, w_m, e_m))
    ref_attn_m, ref_w_m, ref_e_m = semantic_attention_reference(
        query, keys, values, W_t, U_t, b, w_vec, masks=masks)

    np.testing.assert_allclose(np.asarray(e_m), np.asarray(ref_e_m), rtol=RTOL, atol=ATOL)
    np.testing.assert_allclose(np.asarray(w_m), np.asarray(ref_w_m), rtol=RTOL, atol=ATOL)
    np.testing.assert_allclose(np.asarray(attn_m), np.asarray(ref_attn_m), rtol=RTOL, atol=ATOL)

    print("KERNEL_OK")
</pallas_src>

<mosaic_0001>
module attributes {stable_mosaic.version = 11 : i64} {
  func.func @_semantic_attention_kernel(%arg0: i32, %arg1: memref<1x1x24xf32, #tpu.memory_space<vmem>>, %arg2: memref<32x16xf32, #tpu.memory_space<vmem>>, %arg3: memref<32x48xf32, #tpu.memory_space<vmem>>, %arg4: memref<42x32xf32, #tpu.memory_space<vmem>>, %arg5: memref<1x1x48xf32, #tpu.memory_space<vmem>>, %arg6: memref<32x2xf32, #tpu.memory_space<vmem>>) attributes {dimension_semantics = [#tpu.dimension_semantics<parallel>], iteration_bounds = array<i64: 2>, scalar_prefetch = 0 : i64, scratch_operands = 0 : i64, tpu.core_type = #tpu.core_type<tc>, window_params = [{transform_indices = @transform_0, window_bounds = array<i64: 1, 1, 24>}, {transform_indices = @transform_1, window_bounds = array<i64: 32, 16>}, {transform_indices = @transform_2, window_bounds = array<i64: 32, 48>}, {pipeline_mode = #tpu.pipeline_mode<synchronous>, transform_indices = @transform_3, window_bounds = array<i64: 42, 32>}, {transform_indices = @transform_4, window_bounds = array<i64: 1, 1, 48>}, {transform_indices = @transform_5, window_bounds = array<i64: 32, 2>}]} {
    %c0 = arith.constant 0 : index
    %c0_0 = arith.constant 0 : index
    %0 = vector.load %arg4[%c0, %c0_0] : memref<42x32xf32, #tpu.memory_space<vmem>>, vector<24x32xf32>
    %c24 = arith.constant 24 : index
    %c0_1 = arith.constant 0 : index
    %1 = vector.load %arg4[%c24, %c0_1] : memref<42x32xf32, #tpu.memory_space<vmem>>, vector<16x32xf32>
    %c40 = arith.constant 40 : index
    %c0_2 = arith.constant 0 : index
    %2 = vector.load %arg4[%c40, %c0_2] : memref<42x32xf32, #tpu.memory_space<vmem>>, vector<1x32xf32>
    %c41 = arith.constant 41 : index
    %c0_3 = arith.constant 0 : index
    %3 = vector.load %arg4[%c41, %c0_3] : memref<42x32xf32, #tpu.memory_space<vmem>>, vector<1x32xf32>
    %c0_4 = arith.constant 0 : index
    %c0_5 = arith.constant 0 : index
    %c0_6 = arith.constant 0 : index
    %4 = vector.load %arg1[%c0_4, %c0_5, %c0_6] : memref<1x1x24xf32, #tpu.memory_space<vmem>>, vector<1x1x24xf32>
    %5 = vector.shape_cast %4 : vector<1x1x24xf32> to vector<1x24xf32>
    %c0_7 = arith.constant 0 : index
    %c0_8 = arith.constant 0 : index
    %6 = vector.load %arg2[%c0_7, %c0_8] : memref<32x16xf32, #tpu.memory_space<vmem>>, vector<32x16xf32>
    %c0_9 = arith.constant 0 : index
    %c0_10 = arith.constant 0 : index
    %7 = vector.load %arg3[%c0_9, %c0_10] : memref<32x48xf32, #tpu.memory_space<vmem>>, vector<32x48xf32>
    %8 = arith.truncf %5 : vector<1x24xf32> to vector<1x24xbf16>
    %9 = arith.truncf %0 : vector<24x32xf32> to vector<24x32xbf16>
    %cst = arith.constant dense<0.000000e+00> : vector<1x32xf32>
    %10 = tpu.matmul %8, %9, %cst {dimension_numbers = #tpu.dot_dimension_numbers<[1], [0], [0], [1], [0, 0, 1, 1], [], []>} : vector<1x24xbf16>, vector<24x32xbf16>, vector<1x32xf32> -> vector<1x32xf32>
    %11 = arith.addf %10, %2 : vector<1x32xf32>
    %12 = arith.truncf %6 : vector<32x16xf32> to vector<32x16xbf16>
    %13 = arith.truncf %1 : vector<16x32xf32> to vector<16x32xbf16>
    %cst_11 = arith.constant dense<0.000000e+00> : vector<32x32xf32>
    %14 = tpu.matmul %12, %13, %cst_11 {dimension_numbers = #tpu.dot_dimension_numbers<[1], [0], [0], [1], [0, 0, 1, 1], [], []>} : vector<32x16xbf16>, vector<16x32xbf16>, vector<32x32xf32> -> vector<32x32xf32>
    %15 = vector.broadcast %11 : vector<1x32xf32> to vector<32x32xf32>
    %16 = arith.addf %14, %15 : vector<32x32xf32>
    %17 = math.tanh %16 : vector<32x32xf32>
    %cst_12 = arith.constant dense<0.000000e+00> : vector<32x1xf32>
    %18 = tpu.matmul %17, %3, %cst_12 {dimension_numbers = #tpu.dot_dimension_numbers<[1], [1], [0], [0], [0, 0, 1, 0], [], []>} : vector<32x32xf32>, vector<1x32xf32>, vector<32x1xf32> -> vector<32x1xf32>
    %cst_13 = arith.constant dense<0xFF800000> : vector<1xf32>
    %19 = vector.multi_reduction <maximumf>, %18, %cst_13 [0] : vector<32x1xf32> to vector<1xf32>
    %20 = vector.shape_cast %19 : vector<1xf32> to vector<1x1xf32>
    %21 = vector.broadcast %20 : vector<1x1xf32> to vector<32x1xf32>
    %22 = arith.subf %18, %21 : vector<32x1xf32>
    %23 = math.exp %22 : vector<32x1xf32>
    %cst_14 = arith.constant dense<0.000000e+00> : vector<1xf32>
    %24 = vector.multi_reduction <add>, %23, %cst_14 [0] : vector<32x1xf32> to vector<1xf32>
    %25 = vector.shape_cast %24 : vector<1xf32> to vector<1x1xf32>
    %26 = vector.broadcast %25 : vector<1x1xf32> to vector<32x1xf32>
    %27 = arith.divf %23, %26 : vector<32x1xf32>
    %28 = vector.broadcast %27 : vector<32x1xf32> to vector<32x48xf32>
    %29 = arith.mulf %7, %28 : vector<32x48xf32>
    %cst_15 = arith.constant dense<0.000000e+00> : vector<48xf32>
    %30 = vector.multi_reduction <add>, %29, %cst_15 [0] : vector<32x48xf32> to vector<48xf32>
    %31 = vector.shape_cast %30 : vector<48xf32> to vector<1x48xf32>
    %c0_16 = arith.constant 0 : index
    %c0_17 = arith.constant 0 : index
    %c0_18 = arith.constant 0 : index
    %32 = vector.load %arg5[%c0_16, %c0_17, %c0_18] : memref<1x1x48xf32, #tpu.memory_space<vmem>>, vector<1x1x48xf32>
    %33 = vector.shape_cast %32 : vector<1x1x48xf32> to vector<1x48xf32>
    %34 = vector.shape_cast %31 : vector<1x48xf32> to vector<1x1x48xf32>
    tpu.vector_store %arg5[%c0_16, %c0_17, %c0_18], %34 {strides = array<i32>} : memref<1x1x48xf32, #tpu.memory_space<vmem>>, vector<1x1x48xf32>,
    %35 = tpu.concatenate %18, %27 in 1 : vector<32x1xf32>, vector<32x1xf32> -> vector<32x2xf32>
    %c0_19 = arith.constant 0 : index
    %c0_20 = arith.constant 0 : index
    %36 = vector.load %arg6[%c0_19, %c0_20] : memref<32x2xf32, #tpu.memory_space<vmem>>, vector<32x2xf32>
    tpu.vector_store %arg6[%c0_19, %c0_20], %35 {strides = array<i32>} : memref<32x2xf32, #tpu.memory_space<vmem>>, vector<32x2xf32>,
    return
  }
  func.func @transform_0(%arg0: i32) -> (i32, i32, i32) {
    %c0_i32 = arith.constant 0 : i32
    %c0_i32_0 = arith.constant 0 : i32
    %c0_i32_1 = arith.constant 0 : i32
    return %arg0, %c0_i32, %c0_i32_0 : i32, i32, i32
  }
  func.func @transform_1(%arg0: i32) -> (i32, i32) {
    %c0_i32 = arith.constant 0 : i32
    %c0_i32_0 = arith.constant 0 : i32
    return %arg0, %c0_i32 : i32, i32
  }
  func.func @transform_2(%arg0: i32) -> (i32, i32) {
    %c0_i32 = arith.constant 0 : i32
    %c0_i32_0 = arith.constant 0 : i32
    return %arg0, %c0_i32 : i32, i32
  }
  func.func @transform_3(%arg0: i32) -> (i32, i32) {
    %c0_i32 = arith.constant 0 : i32
    %c0_i32_0 = arith.constant 0 : i32
    %c0_i32_1 = arith.constant 0 : i32
    return %c0_i32, %c0_i32_0 : i32, i32
  }
  func.func @transform_4(%arg0: i32) -> (i32, i32, i32) {
    %c0_i32 = arith.constant 0 : i32
    %c0_i32_0 = arith.constant 0 : i32
    %c0_i32_1 = arith.constant 0 : i32
    return %arg0, %c0_i32, %c0_i32_0 : i32, i32, i32
  }
  func.func @transform_5(%arg0: i32) -> (i32, i32) {
    %c0_i32 = arith.constant 0 : i32
    %c0_i32_0 = arith.constant 0 : i32
    return %arg0, %c0_i32 : i32, i32
  }
}

</mosaic_0001>

<bundles_post_ra>
// kernel: tpu_custom_call.1
= control target key start
LH: loop header
LB: loop body
LE: loop exit
PB: predicated region body
PF: predicated region fallthrough
CT: control target
= control target key end

     0   :  { %11 = vsyncpa [#allocation3], 0  ;;  %s969_s0 = inlined_call_operand.vmem [shape: f32[2,1,24], index: 0, kind: input, shape index: {}]   ;;  %s970_s1 = inlined_call_operand.vmem [shape: f32[64,16], index: 1, kind: input, shape index: {}]   ;;  %s971_s2 = inlined_call_operand.vmem [shape: f32[64,48], index: 2, kind: input, shape index: {}]   ;;  %s972_s3 = inlined_call_operand.vmem [shape: f32[42,32], index: 3, kind: input, shape index: {}]   ;;  %s973_s4 = inlined_call_operand.hbm [shape: f32[2,1,48], index: 4, kind: output, shape index: {0}]   ;;  %s974_s5 = inlined_call_operand.vmem [shape: f32[64,2], index: 5, kind: output, shape index: {1}]  }
   0x1   :  { %13 = vsyncpa [#allocation3 + $0x1], 0  ;;  %s811_s18 = smov 0   ;;  %s813_s19 = smov 0  }
   0x2   :  { %s815_s20 = smov 0   ;;  %s817_s21 = smov 0  }
   0x3 LB: > { %s832_s22 = sadd.s32 4294967295, %s776_s21   ;;  %s618_s23 = sadd.s32 4294967294, %s776_s21   ;;  %s776_s21 = sphi %s817_s21, %s980_s21   ;;  %s772_s20 = sphi %s815_s20, %s979_s20   ;;  %s768_s19 = sphi %s813_s19, %s978_s19   ;;  %s764_s18 = sphi %s811_s18, %s977_s18  }
   0x4   : > { %s836_s24 = sadd.s32 1, %s776_s21   ;;  %s125_s25 = sadd.s32 1, %s772_s20 }
   0x5   : > { %s122_s26 = ssub.s32 %s776_s21, %s836_s24  ;;  %p135_p0 = scmp.ne.s32.totalorder %s772_s20, %s768_s19 }
   0x6   : > { %p123_p1 = scmp.eq.s32.totalorder %s122_s26, 0  ;;  %p136_p2 = scmp.eq.s32.totalorder %s832_s22, 1 }
   0x7   : > { %p141_p3 = scmp.ne.s32.totalorder %s768_s19, %s764_s18  ;;  %p142_p4 = scmp.eq.s32.totalorder %s618_s23, 1 }
   0x8   : > { %s847_s27 = scalar_select %p123_p1, %s772_s20, %s125_s25  }
   0x9   : > { %p849_p5 = por %p136_p2, %p135_p0  ;;  %p853_p6 = por %p142_p4, %p141_p3 }
   0xa   : > { %p621_p7 = scmp.ge.s32.totalorder %s776_s21, 1  ;;  %p213_p8 = scmp.lt.s32.totalorder %s776_s21, 3 }
   0xc   : > { %p214_p9 = pnand %p621_p7, %p213_p8 }
   0xd   : > { %v275_v0 = vld [vmem:[%s972_s3] sm:$0xff] (!%p214_p9)  ;;  %v276_v1 = vld [vmem:[%s972_s3 + $0x8] sm:$0xff] (!%p214_p9)  ;;  %v277_v2 = vld [vmem:[%s972_s3 + $0x10] sm:$0xff] (!%p214_p9)  ;;  %v778_v3 = vmov (!%p214_p9), 0.0   ;;  %vm298_vm0 = vcmask (!%p214_p9), 1043456   ;;  %vm779_vm1 = vmmov (!%p214_p9), 0   ;;  %v345_v18 = vlaneseq (!%p214_p9) }
   0xe   : > { %217 = sbr.rel (%p214_p9) target bundleno = 504 (0x1f8), region = 36  ;;  %641 = vmatprep.subr.bf16.mxu0 (!%p214_p9), %v778_v3  ;;  %v292_v4 = vpack.c.bf16 (!%p214_p9), %v276_v1, %v275_v0  ;;  %v293_v5 = vpack.c.bf16 (!%p214_p9), %v277_v2, %v277_v2  ;;  %v278_v6 = vld [vmem:[%s972_s3 + $0x18] sm:$0xff] (!%p214_p9)  ;;  %v279_v7 = vld [vmem:[%s972_s3 + $0x20] sm:$0xff] (!%p214_p9)  ;;  %645 = vmatprep.mubr.msk.bf16.mxu0 (!%p214_p9), %vm779_vm1, %v778_v3  ;;  %p253_p10 = scmp.lt.s32.totalorder (!%p214_p9), %s832_s22, 1  ;;  %vm294_vm2 = vcmask (!%p214_p9), 195584   ;;  %vm349_vm3 = vcmask (!%p214_p9), 130048  }
   0xf   : > { %s622_s15 = sshll.u32 (!%p214_p9), %s832_s22, 2  ;;  %v344_v8 = vpack.c.bf16 (!%p214_p9), %v279_v7, %v278_v6  ;;  %v346_v19 = vshrl.u32 (!%p214_p9), %v345_v18, 7  ;;  %v280_v20 = vld [vmem:[%s972_s3 + $0x28] sm:$0x1] (!%p214_p9)  ;;  %v631_v36 = vld [vmem:[%s972_s3 + $0x29] ss:$0 sm:$0xff] (!%p214_p9) }
  0x10   : > { %p257_p11 = scmp.lt.s32.totalorder (!%p214_p9), %s622_s15, 7  ;;  %642 = vmatpush3.bf16.msra.mxu0 (!%p214_p9), %v292_v4  ;;  %v300_v9 = vsel (!%p214_p9), %vm298_vm0, %v293_v5, 0  ;;  %vm417_vm4 = vcmask (!%p214_p9), 261120   ;;  %vm485_vm5 = vcmask (!%p214_p9), 7168   ;;  %vm469_vm6 = vcmask (!%p214_p9), 392192   ;;  %s244_s23 = sand.u32 (!%p214_p9), 1, %s768_s19  }
  0x11   : > { %643 = vmatprep.subr.bf16.mxu0 (!%p214_p9), %v778_v3  ;;  %649 = vmatprep.subr.bf16.mxu1 (!%p214_p9), %v344_v8  ;;  %v347_v21 = vsub.s32 (!%p214_p9), 0, %v346_v19  ;;  %vm490_vm7 = vcmask (!%p214_p9), 15360   ;;  %vm483_vm8 = vcmask (!%p214_p9), 385024   ;;  %s496_s9 = scalar_lea.sflag (!%p214_p9), [#allocation3], %s244_s23 }
  0x12   : > { %650 = vmatpush3.bf16.msra.mxu1 (!%p214_p9), %v344_v8 }
  0x14   : > { %644 = vmatpush3.bf16.msra.mxu0 (!%p214_p9), %v300_v9 }
  0x15   : > { %s254_s16 = scalar_select %p253_p10, %s832_s22, 1 }
  0x16   : > { %s982_s15 = smov (!%p257_p11, %s622_s15), 7 }
  0x17   : > { %s255_s25 = scalar_lea.vmem %s969_s0, %s254_s16  ;;  %s880_s26 = sshll.u32 %s982_s15, 3 }
  0x18   : > { %v282_v10 = vld [vmem:[%s255_s25] sm:$0x1]  ;;  %s260_s7 = scalar_lea.vmem %s970_s1, %s880_s26  ;;  %s266_s14 = scalar_lea.vmem %s971_s2, %s880_s26 }
  0x19   : > { %v291_v11 = vpack.c.bf16 %v282_v10, %v282_v10  ;;  %v283_v12 = vld [vmem:[%s260_s7] sm:$0xff]  ;;  %v284_v13 = vld [vmem:[%s260_s7 + $0x8] sm:$0xff]  ;;  %v285_v15 = vld [vmem:[%s260_s7 + $0x10] sm:$0xff]  ;;  %s272_s17 = scalar_lea.vmem %s974_s5, %s880_s26  ;;  %s632_s25 = sshll.u32 %s832_s22, 4 }
  0x1a   : > { %v342_v14 = vpack.c.bf16 %v284_v13, %v283_v12  ;;  %v286_v16 = vld [vmem:[%s260_s7 + $0x18] sm:$0xff]  ;;  %s245_s26 = scalar_lea.vmem [#allocation2], %s244_s23  ;;  %s927_s8 = scalar_lea.hbm %s973_s4, %s632_s25 }
  0x1b   : > { %646 = vmatmul.mubr.msk.bf16.vlgmr.msra.gmra.mrb[0].mxu0 %vm294_vm2, %v291_v11  ;;  %v343_v17 = vpack.c.bf16 %v286_v16, %v285_v15  ;;  %s513_s30 = sshll.u32 %s245_s26, 4  ;;  %s780_s22 = smov [#allocation2]   ;;  %s929_s30 = int_to_ptr.vmem [resolvable:$true] %s513_s30 }
  0x1c   : > { %651 = vmatprep.mubr.msk.bf16.mxu1 %vm349_vm3, %v342_v14  ;;  %s714_s10 = scalar_lea.vmem %s929_s30, 16  ;;  %s718_s11 = sshll.u32 %s780_s22, 4  ;;  %s719_s11 = int_to_ptr.vmem [resolvable:$false] %s718_s11 }
  0x1d   : > { %652 = vmatmul.mubr.msk.bf16.vlgmr.msra.gmra.mrb[0].mxu1 %vm349_vm3, %v343_v17  ;;  %p715_p12 = scmp.ne.s32.totalorder %s929_s30, %s714_s10  ;;  %s720_s12 = scalar_lea.vmem %s719_s11, 32 }
  0x1e   : > { %p721_p1 = scmp.lt.s32.totalorder %s929_s30, %s719_s11  ;;  %p722_p2 = scmp.lt.s32.totalorder %s720_s12, %s714_s10 }
  0x1f   : > { %p716_p13 = pnand %p715_p12, %p849_p5 }
  0x20   : > { %p723_p3 = por %p722_p2, %p721_p1 }
  0x21   : > { %p717_p0 = pneg %p716_p13 }
  0x23   : > { %p724_p4 = pnand %p723_p3, %p717_p0 }
  0xee   : > { %v336_v22 = vpop.f32.mrb[0].mxu0 }
  0xef   : > { %v337_v23 = vadd.f32 %v336_v22, %v280_v20  ;;  %v647_v24 = vpop.f32.mrb[1].mxu0  ;;  %v287_v20 = vld [vmem:[%s266_s14] sm:$0xff]  ;;  %v288_v22 = vld [vmem:[%s266_s14 + $0x8] sm:$0xff] }
  0xf0   : > { %v339_v25 = vpop.f32.mrb[2].mxu0  ;;  %v653_v27 = vpop.f32.mrb[0].mxu1 }
  0xf1   : > { %v348_v26 = vrot.slane %v337_v23, %v347_v21  ;;  %v648_v28 = vpop.f32.mrb[3].mxu0  ;;  %v390_v29 = vpop.f32.mrb[1].mxu1  ;;  %v289_v21 = vld [vmem:[%s266_s14 + $0x10] sm:$0xff] }
  0xf2   : > { %v654_v32 = vpop.f32.mrb[2].mxu1 }
  0xf3   : > { %v399_v30 = vadd.f32 %v653_v27, %v348_v26  ;;  %v391_v31 = vadd.f32 %v390_v29, %v348_v26  ;;  %v402_v33 = vadd.f32 %v654_v32, %v348_v26  ;;  %v393_v34 = vpop.f32.mrb[3].mxu1  ;;  %v290_v27 = vld [vmem:[%s266_s14 + $0x18] sm:$0xff] }
  0xf4   : > { %v394_v35 = vadd.f32 %v393_v34, %v348_v26 }
  0xf5   : > { %696 = vtanh.f32 %v399_v30 }
  0xf6   : > { %698 = vtanh.f32 %v391_v31 }
  0xf7   : > { %700 = vtanh.f32 %v402_v33 }
  0xf8   : > { %702 = vtanh.f32 %v394_v35 }
  0xff   : > { %v697_v37 = vpop.eup %696 }
 0x100   : > { %v699_v38 = vpop.eup %698  ;;  %v415_v39 = vmul.f32 %v697_v37, %v631_v36 }
 0x101   : > { %v701_v40 = vpop.eup %700  ;;  %v413_v41 = vmul.f32 %v699_v38, %v631_v36 }
 0x102   : > { %v703_v42 = vpop.eup %702  ;;  %v424_v43 = vsel %vm417_vm4, %v415_v39, 0.0  ;;  %v416_v44 = vmul.f32 %v701_v40, %v631_v36 }
 0x103   : > { %425 = vadd.xlane.f32.xlu1 %v424_v43  ;;  %v418_v45 = vsel %vm417_vm4, %v413_v41, 0.0  ;;  %v414_v46 = vmul.f32 %v703_v42, %v631_v36 }
 0x104   : > { %419 = vadd.xlane.f32.xlu0 %v418_v45  ;;  %v427_v47 = vsel %vm417_vm4, %v416_v44, 0.0 }
 0x105   : > { %v421_v48 = vsel %vm417_vm4, %v414_v46, 0.0 }
 0x107   : > { %428 = vadd.xlane.f32.xlu1 %v427_v47 }
 0x108   : > { %422 = vadd.xlane.f32.xlu0 %v421_v48 }
 0x190   : > { %v892_v49 = vpop.xlane.xlu1 %425 }
 0x191   : > { %v420_v50 = vpop.xlane.xlu0 %419 }
 0x194   : > { %v894_v51 = vpop.xlane.xlu1 %428 }
 0x195   : > { %v431_v52 = vmax.f32 %v892_v49, %v894_v51  ;;  %v423_v53 = vpop.xlane.xlu0 %422 }
 0x196   : > { %v430_v54 = vmax.f32 %v420_v50, %v423_v53 }
 0x198   : > { %v432_v55 = vmax.f32 %v430_v54, %v431_v52 }
 0x19a   : > { %v433_v56 = vrot.slane %v432_v55, 4 }
 0x19c   : > { %v434_v57 = vmax.f32 %v432_v55, %v433_v56 }
 0x19e   : > { %v435_v58 = vrot.slane %v434_v57, 2 }
 0x1a0   : > { %v436_v59 = vmax.f32 %v434_v57, %v435_v58 }
 0x1a2   : > { %v437_v60 = vrot.slane %v436_v59, 1 }
 0x1a4   : > { %v438_v61 = vmax.f32 %v436_v59, %v437_v60 }
 0x1a6   : > { %v439_v62 = vsub.f32 %v420_v50, %v438_v61  ;;  %v440_v63 = vsub.f32 %v423_v53, %v438_v61  ;;  %v441_v0 = vsub.f32 %v892_v49, %v438_v61  ;;  %v442_v1 = vsub.f32 %v894_v51, %v438_v61 }
 0x1a8   : > { %v443_v2 = vmul.f32 1.442695, %v439_v62  ;;  %v445_v3 = vmul.f32 1.442695, %v440_v63  ;;  %v447_v4 = vmul.f32 1.442695, %v441_v0 }
 0x1a9   : > { %v449_v5 = vmul.f32 1.442695, %v442_v1 }
 0x1aa   : > { %704 = vpow2.f32 %v443_v2 }
 0x1ab   : > { %706 = vpow2.f32 %v445_v3 }
 0x1ac   : > { %708 = vpow2.f32 %v447_v4 }
 0x1ad   : > { %710 = vpow2.f32 %v449_v5 }
 0x1b4   : > { %v705_v6 = vpop.eup %704 }
 0x1b5   : > { %v707_v7 = vpop.eup %706 }
 0x1b6   : > { %v451_v8 = vadd.f32 %v707_v7, %v705_v6  ;;  %v709_v9 = vpop.eup %708 }
 0x1b7   : > { %v711_v11 = vpop.eup %710 }
 0x1b8   : > { %v452_v10 = vadd.f32 %v709_v9, %v451_v8 }
 0x1ba   : > { %v453_v12 = vadd.f32 %v711_v11, %v452_v10 }
 0x1bc   : > { %v454_v13 = vrot.slane %v453_v12, 4 }
 0x1be   : > { %v455_v14 = vadd.f32 %v454_v13, %v453_v12 }
 0x1c0   : > { %v456_v15 = vrot.slane %v455_v14, 2 }
 0x1c2   : > { %v457_v16 = vadd.f32 %v456_v15, %v455_v14 }
 0x1c4   : > { %v458_v17 = vrot.slane %v457_v16, 1 }
 0x1c6   : > { %v459_v18 = vadd.f32 %v458_v17, %v457_v16 }
 0x1c8   : > { %712 = vrcp.f32 %v459_v18 }
 0x1d2   : > { %v713_v19 = vpop.eup %712 }
 0x1d3   : > { %v461_v23 = vmul.f32 %v713_v19, %v705_v6  ;;  %v462_v24 = vmul.f32 %v713_v19, %v707_v7  ;;  %v463_v25 = vmul.f32 %v713_v19, %v709_v9  ;;  %v464_v26 = vmul.f32 %v713_v19, %v711_v11 }
 0x1d5   : > { %v465_v28 = vmul.f32 %v461_v23, %v287_v20  ;;  %v466_v29 = vmul.f32 %v462_v24, %v288_v22  ;;  %v467_v30 = vmul.f32 %v463_v25, %v289_v21  ;;  %v486_v31 = vsel %vm485_vm5, %v420_v50, %v461_v23 }
 0x1d6   : > { %v487_v32 = vsel %vm485_vm5, %v423_v53, %v462_v24  ;;  %v468_v33 = vmul.f32 %v464_v26, %v290_v27  ;;  %491 = vst.msk [vmem:[%s272_s17] sm:$0xff] %vm490_vm7, %v486_v31  ;;  %v488_v37 = vsel %vm485_vm5, %v892_v49, %v463_v25  ;;  %v489_v39 = vsel %vm485_vm5, %v894_v51, %v464_v26 }
 0x1d7   : > { %v470_v34 = vsel %vm469_vm6, %v465_v28, 0.0  ;;  %v471_v35 = vsel %vm469_vm6, %v466_v29, 0.0  ;;  %492 = vst.msk [vmem:[%s272_s17 + $0x8] sm:$0xff] %vm490_vm7, %v487_v32  ;;  %v473_v38 = vsel %vm469_vm6, %v467_v30, 0.0  ;;  %493 = vst.msk [vmem:[%s272_s17 + $0x10] sm:$0xff] %vm490_vm7, %v488_v37 }
 0x1d8   : > { %v472_v36 = vadd.f32 %v471_v35, %v470_v34  ;;  %494 = vst.msk [vmem:[%s272_s17 + $0x18] sm:$0xff] %vm490_vm7, %v489_v39  ;;  %v475_v41 = vsel %vm469_vm6, %v468_v33, 0.0 }
 0x1da   : > { %v474_v40 = vadd.f32 %v473_v38, %v472_v36 }
 0x1dc   : > { %v476_v42 = vadd.f32 %v475_v41, %v474_v40 }
 0x1de   : > { %v477_v43 = vrot.slane %v476_v42, 4 }
 0x1e0   : > { %v478_v44 = vadd.f32 %v477_v43, %v476_v42 }
 0x1e2   : > { %v479_v45 = vrot.slane %v478_v44, 2 }
 0x1e4   : > { %v480_v46 = vadd.f32 %v479_v45, %v478_v44 }
 0x1e6   : > { %v481_v47 = vrot.slane %v480_v46, 1 }
 0x1e8   : > { %v482_v48 = vadd.f32 %v481_v47, %v480_v46 }
 0x1ea   : > { %484 = vst.msk [vmem:[%s245_s26] sm:$0x1] %vm483_vm8, %v482_v48 }
 0x1eb   : > { %727 = shalt.err (!%p724_p4)
}
 0x1ec   : > { %s728_s13 = scalar_lea.hbm %s927_s8, 16  ;;  %s732_s16 = scalar_lea.hbm %s973_s4, 32 }
 0x1ed   : > { %p729_p7 = scmp.ne.s32.totalorder %s927_s8, %s728_s13  ;;  %p733_p10 = scmp.lt.u32.totalorder %s927_s8, %s973_s4 }
 0x1ee   : > { %p734_p11 = scmp.lt.u32.totalorder %s732_s16, %s728_s13  ;;  %p736_p13 = scmp.lt.u32.totalorder %s728_s13, %s927_s8 }
 0x1ef   : > { %p730_p8 = pnand %p729_p7, %p849_p5 }
 0x1f0   : > { %p735_p12 = por %p734_p11, %p733_p10 }
 0x1f1   : > { %p731_p9 = pneg %p730_p8 }
 0x1f2   : > { %p737_p0 = por %p736_p13, %p735_p12 }
 0x1f4   : > { %p738_p1 = pnand %p737_p0, %p731_p9 }
 0x1f6   : > { %741 = shalt.err (!%p738_p1)
}
 0x1f7   : > { %655 = dma.vmem_to_hbm [thread:$0]  (%p849_p5), %s929_s30, 16, %s927_s8, %s496_s9  }
 0x1f8 PF: > { %p661_p2 = scmp.ge.s32.totalorder %s776_s21, 2  ;;  %s529_s25 = sand.u32 1, %s764_s18  }
 0x1f9   : > { %s530_s26 = scalar_lea.sflag [#allocation3], %s529_s25 }
 0x1fa   : > { %p658_p3 = pnand %p661_p2, %p853_p6 }
 0x1fc   : > { %759 = dma.done.wait (!%p658_p3), %s530_s26, 16  }
 0x1fd   : > { %761 = vsyncadd (!%p658_p3), %s530_s26, 4294967280  ;;  %p16_p4 = scmp.ge.s32.totalorder %s836_s24, 4   ;;  %s977_s18 = smov %s768_s19 }
 0x1fe   : > { %s978_s19 = smov %s772_s20  ;;  %s979_s20 = smov %s847_s27 }
 0x1ff   : > { %s980_s21 = smov %s836_s24  ;;  %18 = sbr.rel (!%p16_p4) target bundleno = 3 (0x3), region = 89 }
 0x206   :  { %542 = vsyncpa [#allocation3], 1 }
 0x207   :  { %544 = vsyncpa [#allocation3 + $0x1], 1 }

</bundles_post_ra>
